<compile_context>
chip_gen: v6e
topology: v6e:2x2x1
jax: 0.10.0
libtpu: 0.0.40
codegen_flags: <defaults>
</compile_context>

<pallas_src>
import jax
import jax.numpy as jnp
from jax import lax
from jax.experimental import pallas as pl
from jax.experimental.pallas import tpu as pltpu

_EPS = 1e-5

# Module configuration (matches the PyTorch defaults) and problem size.
STEPS = 4
C_IN = 2
F0 = 4
N, H0, W0 = 2, 16, 24                      # torch equivalent: x (2, 2, 16, 24) NCHW

IN_F = [C_IN] + [F0 * 2 ** i for i in range(STEPS - 1)]     # [2, 4, 8, 16]
OUT_F = [F0 * 2 ** i for i in range(STEPS)]                 # [4, 8, 16, 32]

# Canonical flat-slab width.  Block b uses row pitch P_b = W0 * 2**b and has
# H_b = H0 / 2**b rows; data rows live at lanes [P_b + h*P_b, P_b + h*P_b + W0).
SPAD = max((H0 // 2 ** b + 2) * (W0 * 2 ** b) for b in range(STEPS))    # = 768


# ---------------------------------------------------------------------------
# pltpu.roll direction probe (tiny one-off kernel) so the tap-shift helper is
# robust to the rotation-sign convention.
# ---------------------------------------------------------------------------
_ROLL_LIKE_JNP = True


def _detect_roll_direction():
    global _ROLL_LIKE_JNP

    def k(x_ref, o_ref):
        o_ref[...] = pltpu.roll(x_ref[...], 1, axis=1)

    x = jnp.arange(8 * 128, dtype=jnp.float32).reshape(8, 128)
    y = pl.pallas_call(k, out_shape=jax.ShapeDtypeStruct((8, 128), jnp.float32))(x)
    _ROLL_LIKE_JNP = bool(jnp.array_equal(y, jnp.roll(x, 1, axis=1)))


def _shift_read(x, off, size):
    """Return y with y[..., i] = x[..., (i + off) % size] (roll along lanes)."""
    if off % size == 0:
        return x
    s = (-off) % size if _ROLL_LIKE_JNP else off % size
    return pltpu.roll(x, s, axis=1)


# ---------------------------------------------------------------------------
# Fused encoder kernel: all 4 blocks for one batch sample per grid step.
# ---------------------------------------------------------------------------
def _encoder_kernel(*refs):
    # refs: x_slab, (w1T, b1, w2T, b2) * STEPS, out_0..out_{STEPS-1}, y_final
    x_ref = refs[0]
    w_refs = refs[1:1 + 4 * STEPS]
    out_refs = refs[1 + 4 * STEPS:]

    slab = x_ref[0]                           # (C_in, SPAD) f32, block-0 canonical slab
    P = W0                                    # row pitch of the current block
    H = H0                                    # rows of the current block

    for b in range(STEPS):
        w1t_ref, b1_ref, w2t_ref, b2_ref = w_refs[4 * b: 4 * b + 4]
        lo, hi = P, (H + 1) * P               # canonical data lane range of this block

        def conv_bn_relu(s, wt_ref, bias_ref, pitch=P):
            # 3x3 conv (padding (1,0)) as 9 lane-rolls + 9 MXU matmuls; BN scale
            # is pre-folded into the weights, BN/conv bias into bias_ref.
            acc = None
            for kh in range(3):
                for kw in range(3):
                    off = (kh - 1) * pitch + kw
                    tap = _shift_read(s, off, SPAD)          # (Cin, SPAD)
                    d = jnp.dot(wt_ref[kh, kw], tap,          # (Cout, Cin) @ (Cin, SPAD)
                                preferred_element_type=jnp.float32,
                                precision=lax.Precision.HIGHEST)
                    acc = d if acc is None else acc + d
            return jnp.maximum(acc + bias_ref[...], 0.0)      # bias_ref: (Cout, 1)

        # conv1 + BN1 + ReLU, then zero everything outside the data rows so the
        # H-padding rows seen by conv2 are exact zeros (no scratch round trip).
        y1 = conv_bn_relu(slab, w1t_ref, b1_ref)
        lane1 = lax.broadcasted_iota(jnp.int32, y1.shape, 1)
        y1 = jnp.where((lane1 >= lo) & (lane1 < hi), y1, 0.0)

        # conv2 + BN2 + ReLU
        y2 = conv_bn_relu(y1, w2t_ref, b2_ref)
        out_refs[b][0] = y2                   # full lane-dense store; wrapper slices valid region

        # max_pool2d(kernel=(2,1)) along H + reposition into the next block's
        # canonical layout (pitch doubles, data starts at lane 2*P), pads zeroed.
        pooled = jnp.maximum(y2, _shift_read(y2, P, SPAD))
        nxt = _shift_read(pooled, -P, SPAD)
        P2, H2 = 2 * P, H // 2
        lane2 = lax.broadcasted_iota(jnp.int32, nxt.shape, 1)
        slab = jnp.where((lane2 >= P2) & (lane2 < (H2 + 1) * P2), nxt, 0.0)
        P, H = P2, H2

    out_refs[STEPS][0] = slab                 # final pooled activation (encoder output y)


def _down_unet_encoder_pallas(x_slab, weight_args):
    n = x_slab.shape[0]

    in_specs = [pl.BlockSpec((1, C_IN, SPAD), lambda i: (i, 0, 0))]
    for b in range(STEPS):
        ci, co = IN_F[b], OUT_F[b]
        in_specs += [
            pl.BlockSpec((3, 3, co, ci), lambda i: (0, 0, 0, 0)),   # w1 (BN-folded, transposed)
            pl.BlockSpec((co, 1), lambda i: (0, 0)),                # b1 (folded)
            pl.BlockSpec((3, 3, co, co), lambda i: (0, 0, 0, 0)),   # w2
            pl.BlockSpec((co, 1), lambda i: (0, 0)),                # b2
        ]

    out_specs = [pl.BlockSpec((1, OUT_F[b], SPAD), lambda i: (i, 0, 0))
                 for b in range(STEPS)]
    out_specs.append(pl.BlockSpec((1, OUT_F[-1], SPAD), lambda i: (i, 0, 0)))

    out_shape = tuple(jax.ShapeDtypeStruct((n, OUT_F[b], SPAD), jnp.float32)
                      for b in range(STEPS))
    out_shape = out_shape + (jax.ShapeDtypeStruct((n, OUT_F[-1], SPAD), jnp.float32),)

    grid_spec = pltpu.PrefetchScalarGridSpec(
        num_scalar_prefetch=0,
        grid=(n,),
        in_specs=in_specs,
        out_specs=out_specs,
    )

    return pl.pallas_call(
        _encoder_kernel,
        out_shape=out_shape,
        grid_spec=grid_spec,
        compiler_params=pltpu.CompilerParams(
            dimension_semantics=("parallel",)),   # batch axis independent -> v7x 2nd TC
    )(x_slab, *weight_args)


# ---------------------------------------------------------------------------
# BN folding (eval mode) + layout plumbing (wrapper side, plain XLA ops).
# ---------------------------------------------------------------------------
def _fold_conv_bn(p):
    scale = p["gamma"] / jnp.sqrt(p["var"] + _EPS)
    bias = p["beta"] + scale * (p["b"] - p["mean"])
    # fold BN scale into the conv weights and transpose HWIO -> (3, 3, Cout, Cin)
    w_t = jnp.transpose(p["w"] * scale[None, None, None, :], (0, 1, 3, 2))
    return w_t.astype(jnp.float32), bias.reshape(-1, 1).astype(jnp.float32)


@jax.jit
def encoder_forward(x, params):
    # x: (N, H, W, Cin) NHWC float32 (torch reference is NCHW transposed by (0,2,3,1))
    n, h, w, cin = x.shape

    # build block-0 canonical slab (N, Cin, SPAD): row h at lanes [W0 + h*W0, ...)
    x_flat = jnp.transpose(x, (0, 3, 1, 2)).reshape(n, cin, h * w)
    slab0 = jnp.zeros((n, cin, SPAD), jnp.float32).at[:, :, W0:W0 + h * w].set(x_flat)

    weight_args = []
    for (p1, p2) in params:
        w1t, b1 = _fold_conv_bn(p1)
        w2t, b2 = _fold_conv_bn(p2)
        weight_args += [w1t, b1, w2t, b2]

    outs = _down_unet_encoder_pallas(slab0, weight_args)

    # extract valid regions from the flat slabs back into NHWC tensors
    block_outs = []
    hb, pb = H0, W0
    for b in range(STEPS):
        w_valid = W0 - 4 * (b + 1)
        y = outs[b][:, :, pb:pb + hb * pb].reshape(n, OUT_F[b], hb, pb)[:, :, :, :w_valid]
        block_outs.append(jnp.transpose(y, (0, 2, 3, 1)))            # (N, H_b, W2_b, C_b)
        hb, pb = hb // 2, pb * 2

    w_final = W0 - 4 * STEPS
    y_final = outs[STEPS][:, :, pb:pb + w_final].reshape(n, OUT_F[-1], hb, w_final)
    y_final = jnp.transpose(y_final, (0, 2, 3, 1))                   # (N, 1, 8, 32)
    return y_final, block_outs


# ---------------------------------------------------------------------------
# Deterministic synthetic parameters + pure-JAX reference (eval-mode BN).
# ---------------------------------------------------------------------------
def _make_conv_bn(key, cin, cout):
    kw_, kb_, kg_, kbe_, km_, kv_ = jax.random.split(key, 6)
    return dict(
        w=0.3 * jax.random.normal(kw_, (3, 3, cin, cout), jnp.float32),   # HWIO
        b=0.1 * jax.random.normal(kb_, (cout,), jnp.float32),
        gamma=1.0 + 0.1 * jax.random.normal(kg_, (cout,), jnp.float32),
        beta=0.1 * jax.random.normal(kbe_, (cout,), jnp.float32),
        mean=0.1 * jax.random.normal(km_, (cout,), jnp.float32),
        var=0.5 + jnp.abs(jax.random.normal(kv_, (cout,), jnp.float32)),
    )


def _ref_conv_bn_relu(x, p):
    y = lax.conv_general_dilated(
        x, p["w"], window_strides=(1, 1), padding=((1, 1), (0, 0)),
        dimension_numbers=("NHWC", "HWIO", "NHWC"),
        precision=lax.Precision.HIGHEST)
    y = y + p["b"].reshape(1, 1, 1, -1)
    y = (y - p["mean"]) / jnp.sqrt(p["var"] + _EPS) * p["gamma"] + p["beta"]
    return jax.nn.relu(y)


def encoder_reference(x, params):
    outs = []
    y = x
    for (p1, p2) in params:
        y = _ref_conv_bn_relu(_ref_conv_bn_relu(y, p1), p2)
        outs.append(y)
        y = jnp.maximum(y[:, 0::2], y[:, 1::2])       # max_pool2d kernel=(2,1)
    return y, outs


# ---------------------------------------------------------------------------
if __name__ == "__main__":
    _detect_roll_direction()

    key = jax.random.PRNGKey(0)
    kx, kp = jax.random.split(key)
    x = jax.random.normal(kx, (N, H0, W0, C_IN), jnp.float32)   # layout: NHWC

    pkeys = jax.random.split(kp, STEPS * 2)
    params = []
    for i in range(STEPS):
        p1 = _make_conv_bn(pkeys[2 * i], IN_F[i], OUT_F[i])
        p2 = _make_conv_bn(pkeys[2 * i + 1], OUT_F[i], OUT_F[i])
        params.append((p1, p2))

    y, outs = encoder_forward(x, params)
    jax.block_until_ready(y)
    jax.block_until_ready(outs)

    # correctness check vs. pure-JAX reference (same eval-mode BN semantics)
    y_ref, outs_ref = encoder_reference(x, params)
    for i, (a, b_ref) in enumerate(zip(outs, outs_ref)):
        assert a.shape == b_ref.shape, (i, a.shape, b_ref.shape)
        assert jnp.allclose(a, b_ref, rtol=2e-3, atol=2e-3), f"block {i} mismatch"
    assert y.shape == y_ref.shape
    assert jnp.allclose(y, y_ref, rtol=2e-3, atol=2e-3), "final output mismatch"

    print("KERNEL_OK")
</pallas_src>

<mosaic_0001>
module attributes {stable_mosaic.version = 11 : i64} {
  func.func @k(%arg0: memref<8x128xf32, #tpu.memory_space<vmem>>, %arg1: memref<8x128xf32, #tpu.memory_space<vmem>>) attributes {dimension_semantics = [], scalar_prefetch = 0 : i64, scratch_operands = 0 : i64, tpu.core_type = #tpu.core_type<tc>} {
    %c0 = arith.constant 0 : index
    %c0_0 = arith.constant 0 : index
    %0 = vector.load %arg0[%c0, %c0_0] : memref<8x128xf32, #tpu.memory_space<vmem>>, vector<8x128xf32>
    %c1_i32 = arith.constant 1 : i32
    %1 = tpu.dynamic_rotate %0 by %c1_i32 dim 1 : vector<8x128xf32>, i32 -> vector<8x128xf32>
    %c0_1 = arith.constant 0 : index
    %c0_2 = arith.constant 0 : index
    %2 = vector.load %arg1[%c0_1, %c0_2] : memref<8x128xf32, #tpu.memory_space<vmem>>, vector<8x128xf32>
    tpu.vector_store %arg1[%c0_1, %c0_2], %1 {strides = array<i32>} : memref<8x128xf32, #tpu.memory_space<vmem>>, vector<8x128xf32>,
    return
  }
}

</mosaic_0001>

<bundles_post_ra>
// kernel: tpu_custom_call.1
= control target key start
LH: loop header
LB: loop body
LE: loop exit
PB: predicated region body
PF: predicated region fallthrough
CT: control target
= control target key end

     0   :  { %6 = vsyncpa [#allocation3], 0  ;;  %s106_s0 = inlined_call_operand.hbm [shape: f32[8,128], index: 0, kind: input, shape index: {}]   ;;  %s107_s1 = inlined_call_operand.hbm [shape: f32[8,128], index: 1, kind: output, shape index: {}]  }
   0x1   :  { %7 = vsyncpa [#allocation4], 0  ;;  %s87_s6 = smov [#allocation2]  }
   0x2   :  { %s14_s7 = sshll.u32 %s87_s6, 4  ;;  %s15_s7 = int_to_ptr.vmem [resolvable:$true] %s14_s7 }
   0x3   :  { %s51_s8 = scalar_lea.vmem %s15_s7, 128  ;;  %p56_p1 = scmp.lt.s32.totalorder %s15_s7, %s15_s7 }
   0x4   :  { %p52_p0 = scmp.ne.s32.totalorder %s15_s7, %s51_s8  ;;  %p57_p2 = scmp.lt.s32.totalorder %s51_s8, %s51_s8 }
   0x6   :  { %p58_p3 = por %p57_p2, %p56_p1 }
   0x8   :  { %p59_p4 = pnand %p58_p3, %p52_p0 }
   0xa   :  { %62 = shalt.err (!%p59_p4)
}
   0xb   :  { %17 = dma.hbm_to_vmem [thread:$0]  %s106_s0, 128, %s15_s7, [#allocation3]  }
   0xc   :  { %83 = dma.done.wait [#allocation3], 128  }
   0xd   :  { %84 = vsyncadd [#allocation3], 4294967168  ;;  %v21_v0 = vld [vmem:[#allocation2] sm:$0xff]  ;;  %s88_s11 = smov 1   ;;  %s89_s12 = smov [#allocation5]  }
   0xe   :  { %22 = vrot.lane.b32.xlu0 %v21_v0, %s88_s11  ;;  %s31_s13 = sshll.u32 %s89_s12, 4  ;;  %s32_s13 = int_to_ptr.vmem [resolvable:$true] %s31_s13 }
   0xf   :  { %s63_s14 = scalar_lea.vmem %s32_s13, 128  ;;  %p68_p6 = scmp.lt.s32.totalorder %s32_s13, %s32_s13 }
  0x10   :  { %p64_p5 = scmp.ne.s32.totalorder %s32_s13, %s63_s14  ;;  %p69_p7 = scmp.lt.s32.totalorder %s63_s14, %s63_s14 }
  0x12   :  { %p70_p8 = por %p69_p7, %p68_p6 }
  0x14   :  { %p71_p9 = pnand %p70_p8, %p64_p5 }
  0x80   :  { %v23_v1 = vpop.permute.xlu0 %22 }
  0x81   :  { %24 = vst [vmem:[#allocation5] sm:$0xff] %v23_v1 }
  0x82   :  { %74 = shalt.err (!%p71_p9)
}
  0x83   :  { %34 = dma.vmem_to_hbm [thread:$0]  %s32_s13, 128, %s107_s1, [#allocation4]  }
  0x84   :  { %85 = dma.done.wait [#allocation4], 128  }
  0x85   :  { %86 = vsyncadd [#allocation4], 4294967168 }
  0x86   :  { %38 = vsyncpa [#allocation3], 1 }
  0x87   :  { %39 = vsyncpa [#allocation4], 1 }

</bundles_post_ra>
